<compile_context>
chip_gen: v6e
topology: v6e:2x2x1
jax: 0.10.0
libtpu: 0.0.40
codegen_flags: <defaults>
</compile_context>

<pallas_src>
import functools
import math

import jax
import jax.numpy as jnp
from jax.experimental import pallas as pl
from jax.experimental.pallas import tpu as pltpu


def _round_up(v, m):
    return (v + m - 1) // m * m


def _vmem_budget_bytes():
    """Physical per-core VMEM minus headroom (Mosaic scratch, semaphores)."""
    try:
        cap = int(pltpu.get_tpu_info().vmem_capacity_bytes)
    except Exception:
        cap = 64 << 20  # conservative fallback: v7x per-TensorCore VMEM
    # ~52 MiB on v7x (64 MiB), ~112 MiB on v5e/v6e (128 MiB).
    return cap - max(12 << 20, cap // 8)


def _choose_hidden_tiling(ip, h_sz, w_itemsize, vmem_budget):
    """Pick padded hidden size hp and hidden-column tile hc (both x128).

    Keep all weights VMEM-resident (hc == hp, single-buffered) when they fit;
    otherwise tile the gate/output-column axis so only one (double-buffered)
    weight column slab is resident per grid step (required on v7x's 64 MiB)."""
    def w_bytes(hp, hc, bufs):
        return bufs * (((ip + hp) * 2 * hc + ip * hc + hp * hc) * w_itemsize
                       + 4 * hc * 4)

    def act_bytes(hp, hc, bt=256):
        # double-buffered xh + out tiles + in-kernel f32 intermediates
        return (2 * bt * (ip + hp) * w_itemsize + 2 * bt * hc * 4
                + bt * 8 * hc * 4)

    budget = max(vmem_budget - (4 << 20), 8 << 20)
    hp0 = _round_up(h_sz, 128)
    if w_bytes(hp0, hp0, 1) + act_bytes(hp0, hp0) <= budget:
        return hp0, hp0
    for hc in (2048, 1024, 512, 256, 128):
        hp = _round_up(h_sz, hc)
        if w_bytes(hp, hc, 2) + act_bytes(hp, hc) <= budget:
            return hp, hc
    return _round_up(h_sz, 128), 128


def _gru_kernel(xh_ref, wrz_ref, brz_ref, win_ref, bin_ref, whn_ref, bhn_ref,
                o_ref, *, ip, hc):
    """One (batch-tile, hidden-column-tile) step of the GRU cell.

    xh_ref = [x | h] packed along lanes (x in cols [0:ip), h in cols [ip:)),
    stored in the MXU operand dtype. All gate math is done in f32."""
    j = pl.program_id(1)                       # hidden-column block index

    xh_m = xh_ref[...]                         # [bt, ip+hp], MXU dtype
    x_m = xh_m[:, :ip]
    h_m = xh_m[:, ip:]

    # Fused r/z pre-activations for this hidden-column block:
    #   g_rz = [x@W_ir + h@W_hr + (b_ir+b_hr) | x@W_iz + h@W_hz + (b_iz+b_hz)]
    g_rz = jnp.dot(xh_m, wrz_ref[...],
                   preferred_element_type=jnp.float32) + brz_ref[...]
    r = jax.nn.sigmoid(g_rz[:, :hc])
    z = jax.nn.sigmoid(g_rz[:, hc:])

    # n-gate: r gates only the hidden contribution, so keep the dots separate.
    i_n = jnp.dot(x_m, win_ref[...],
                  preferred_element_type=jnp.float32) + bin_ref[...]
    h_n = jnp.dot(h_m, whn_ref[...],
                  preferred_element_type=jnp.float32) + bhn_ref[...]
    h_tilde = jnp.tanh(i_n + r * h_n)

    # Previous hidden state for this column block (lane-aligned dynamic slice).
    h_off = pl.multiple_of(ip + j * hc, 128)
    h_blk = xh_ref[:, pl.ds(h_off, hc)].astype(jnp.float32)

    o_ref[...] = (z * h_blk + (1.0 - z) * h_tilde).astype(o_ref.dtype)


def pack_gru_params(w_i, b_i, w_h, b_h, mxu_dtype=jnp.bfloat16, col_tile=None):
    """One-time re-pack of PyTorch-layout params ([I,3H],[3H],[H,3H],[3H]) into
    lane-aligned, per-gate, per-hidden-column-block slabs.

    Hoist this out of any per-timestep loop."""
    i_sz, h3 = w_i.shape
    h_sz = h3 // 3
    ip = _round_up(i_sz, 128)
    w_isz = jnp.dtype(mxu_dtype).itemsize

    if col_tile is None:
        hp, hc = _choose_hidden_tiling(ip, h_sz, w_isz, _vmem_budget_bytes())
    else:
        hc = _round_up(col_tile, 128)
        hp = _round_up(h_sz, hc)
    nh = hp // hc

    w_i = w_i.astype(jnp.float32)
    w_h = w_h.astype(jnp.float32)
    b_i = b_i.astype(jnp.float32)
    b_h = b_h.astype(jnp.float32)

    # Fused [x|h] -> per-gate padded slabs for r and z.
    def rz_slab(g):
        s = jnp.zeros((ip + hp, hp), jnp.float32)
        s = s.at[:i_sz, :h_sz].set(w_i[:, g * h_sz:(g + 1) * h_sz])
        s = s.at[ip:ip + h_sz, :h_sz].set(w_h[:, g * h_sz:(g + 1) * h_sz])
        return s

    w_r, w_z = rz_slab(0), rz_slab(1)
    # Interleave r/z columns per hc-block -> [r_blk0 | z_blk0 | r_blk1 | ...] so
    # each grid step's (ip+hp, 2*hc) weight tile is one contiguous column slab.
    w_rz = jnp.stack([w_r.reshape(ip + hp, nh, hc),
                      w_z.reshape(ip + hp, nh, hc)], axis=2)
    w_rz = w_rz.reshape(ip + hp, 2 * hp)

    def rz_bias(g):
        return (jnp.zeros((hp,), jnp.float32)
                .at[:h_sz].set(b_i[g * h_sz:(g + 1) * h_sz]
                               + b_h[g * h_sz:(g + 1) * h_sz]))

    b_rz = jnp.stack([rz_bias(0).reshape(nh, hc),
                      rz_bias(1).reshape(nh, hc)], axis=1).reshape(1, 2 * hp)

    # n-gate slabs (column blocks are already contiguous).
    w_in = jnp.zeros((ip, hp), jnp.float32).at[:i_sz, :h_sz].set(w_i[:, 2 * h_sz:])
    b_in = jnp.zeros((1, hp), jnp.float32).at[0, :h_sz].set(b_i[2 * h_sz:])
    w_hn = jnp.zeros((hp, hp), jnp.float32).at[:h_sz, :h_sz].set(w_h[:, 2 * h_sz:])
    b_hn = jnp.zeros((1, hp), jnp.float32).at[0, :h_sz].set(b_h[2 * h_sz:])

    # TODO(synk): optional v7x variant: store the weight slabs in fp8 (e4m3)
    # with a per-slab scale folded in after the f32 accumulation, halving
    # resident weight VMEM against the 64 MiB/TC budget.
    # TODO(synk): optional small-H v5e/v6e variant: append block-diagonal
    # [W_in;0]/[0;W_hn] column slabs to W_rz so all four pre-activations come
    # from one wide MXU dot (MRF cadence-limited regime).
    packed = (w_rz.astype(mxu_dtype), b_rz, w_in.astype(mxu_dtype), b_in,
              w_hn.astype(mxu_dtype), b_hn)
    return packed, (i_sz, h_sz, ip, hp, hc)


def gru_cell_packed(x, h, packed, dims, *, block_b=256):
    """GRU cell on pre-packed params. x: [B, I], h: [B, H] -> [B, H]."""
    w_rz, b_rz, w_in, b_in, w_hn, b_hn = packed
    i_sz, h_sz, ip, hp, hc = dims
    nh = hp // hc
    b_sz = x.shape[0]
    mxu_dtype = w_rz.dtype

    # Megacore-aware batch tiling: prefer >=2 grid steps on the "parallel"
    # batch axis so both v7x TensorCores get work; cap the tile at block_b.
    block_b = max(8, _round_up(block_b, 8))
    b_al = _round_up(b_sz, 8)
    if b_al <= 2 * block_b:
        bt = min(block_b, max(8, _round_up((b_al + 1) // 2, 8)))
    else:
        bt = block_b
    bp = _round_up(b_sz, bt)
    nb = bp // bt

    # Pack activations lane-dense in the MXU dtype: [x | h], each slab
    # 128-aligned (halves the streamed DMA bytes vs an f32 slab).
    xh = jnp.zeros((bp, ip + hp), mxu_dtype)
    xh = xh.at[:b_sz, :i_sz].set(x.astype(mxu_dtype))
    xh = xh.at[:b_sz, ip:ip + h_sz].set(h.astype(mxu_dtype))
    # TODO(synk): for recurrent use (lax.scan over time), keep h in the padded
    # [bp, hp] layout across steps (no per-step zeros+scatter pack and no
    # [:b_sz,:h_sz] slice), feed the padded output straight back (optionally
    # via input_output_aliases), and precompute x @ W_i for the whole sequence
    # in one large matmul outside the loop.

    w_isz = jnp.dtype(mxu_dtype).itemsize
    o_isz = jnp.dtype(h.dtype).itemsize
    vmem_budget = _vmem_budget_bytes()
    w_blk_bytes = ((ip + hp) * 2 * hc + ip * hc + hp * hc) * w_isz + 4 * hc * 4

    def vmem_limit(weight_bufs):
        act = 2 * bt * (ip + hp) * w_isz          # double-buffered xh tiles
        out = 2 * bt * hc * o_isz                 # double-buffered output tiles
        interm = bt * 8 * hc * 4                  # f32 g_rz/r/z/i_n/h_n/h_tilde/h_blk
        need = weight_bufs * w_blk_bytes + act + out + interm + (2 << 20)
        return int(min(max(need, 4 << 20), vmem_budget))

    flops = int(2 * bp * ((ip + hp) * 2 * hp + ip * hp + hp * hp))
    bytes_accessed = int(int(xh.size) * w_isz + nb * nh * w_blk_bytes
                         + bp * hp * o_isz)

    kernel = functools.partial(_gru_kernel, ip=ip, hc=hc)

    def run(single_buffer_weights):
        # Constant-index (fully resident) weight slabs only need one VMEM
        # buffer; keep default double-buffering when the gate axis streams
        # different column blocks each step.
        wkw = ({"pipeline_mode": pl.Buffered(1)} if single_buffer_weights
               else {})
        return pl.pallas_call(
            kernel,
            out_shape=jax.ShapeDtypeStruct((bp, hp), h.dtype),
            grid=(nb, nh),
            in_specs=[
                pl.BlockSpec((bt, ip + hp), lambda i, j: (i, 0)),          # xh tile
                pl.BlockSpec((ip + hp, 2 * hc), lambda i, j: (0, j), **wkw),  # W_rz
                pl.BlockSpec((1, 2 * hc), lambda i, j: (0, j), **wkw),        # b_rz
                pl.BlockSpec((ip, hc), lambda i, j: (0, j), **wkw),           # W_in
                pl.BlockSpec((1, hc), lambda i, j: (0, j), **wkw),            # b_in
                pl.BlockSpec((hp, hc), lambda i, j: (0, j), **wkw),           # W_hn
                pl.BlockSpec((1, hc), lambda i, j: (0, j), **wkw),            # b_hn
            ],
            out_specs=pl.BlockSpec((bt, hc), lambda i, j: (i, j)),
            compiler_params=pltpu.CompilerParams(
                dimension_semantics=("parallel", "arbitrary"),
                vmem_limit_bytes=vmem_limit(1 if single_buffer_weights else 2)),
            cost_estimate=pl.CostEstimate(
                flops=flops,
                transcendentals=int(3 * bp * hp),
                bytes_accessed=bytes_accessed),
        )(xh, w_rz, b_rz, w_in, b_in, w_hn, b_hn)

    if nh == 1:
        try:
            out_p = run(True)
        except Exception:
            # pl.Buffered(1) not supported on this jax/libtpu combo: fall back
            # to default (double-buffered) weight specs.
            out_p = run(False)
    else:
        out_p = run(False)

    return out_p[:b_sz, :h_sz]


def gru_cell(x, h, w_i, b_i, w_h, b_h, *, block_b=256, mxu_dtype=jnp.bfloat16):
    """Convenience wrapper matching the PyTorch GRUCell.forward signature."""
    packed, dims = pack_gru_params(w_i, b_i, w_h, b_h, mxu_dtype=mxu_dtype)
    return gru_cell_packed(x, h, packed, dims, block_b=block_b)


def init_params(key, input_size, hidden_size, dtype=jnp.float32):
    """Deterministic xavier-normal init matching the PyTorch module."""
    k1, k2 = jax.random.split(key)

    def xavier_normal(k, shape):
        fan_in, fan_out = shape
        std = math.sqrt(2.0 / (fan_in + fan_out))
        return (jax.random.normal(k, shape, jnp.float32) * std).astype(dtype)

    w_i = xavier_normal(k1, (input_size, hidden_size * 3))
    b_i = jnp.zeros((hidden_size * 3,), dtype)
    w_h = xavier_normal(k2, (hidden_size, hidden_size * 3))
    b_h = jnp.zeros((hidden_size * 3,), dtype)
    return w_i, b_i, w_h, b_h


def gru_cell_ref(x, h, w_i, b_i, w_h, b_h):
    """Pure-JAX f32 reference mirroring the PyTorch forward."""
    gi = x @ w_i + b_i
    gh = h @ w_h + b_h
    H = h.shape[-1]
    i_r, i_z, i_n = gi[:, :H], gi[:, H:2 * H], gi[:, 2 * H:]
    h_r, h_z, h_n = gh[:, :H], gh[:, H:2 * H], gh[:, 2 * H:]
    r = jax.nn.sigmoid(i_r + h_r)
    z = jax.nn.sigmoid(i_z + h_z)
    h_tilde = jnp.tanh(i_n + r * h_n)
    return z * h + (1 - z) * h_tilde


if __name__ == "__main__":
    key = jax.random.PRNGKey(0)

    # --- Test 1: small shapes, f32 and bf16 MXU paths -----------------------
    B, INPUT, HIDDEN = 8, 16, 32
    kx, kh, kp, key = *jax.random.split(key, 3), jax.random.split(key, 4)[3]
    x = jax.random.normal(kx, (B, INPUT), jnp.float32)
    h = jax.random.normal(kh, (B, HIDDEN), jnp.float32)
    w_i, b_i, w_h, b_h = init_params(kp, INPUT, HIDDEN)
    ref = gru_cell_ref(x, h, w_i, b_i, w_h, b_h)

    out_f32 = jax.block_until_ready(
        gru_cell(x, h, w_i, b_i, w_h, b_h, mxu_dtype=jnp.float32))
    assert out_f32.shape == (B, HIDDEN)
    assert jnp.allclose(out_f32, ref, atol=1e-5, rtol=1e-5), "f32 path mismatch"

    out_bf16 = jax.block_until_ready(gru_cell(x, h, w_i, b_i, w_h, b_h))
    assert out_bf16.shape == (B, HIDDEN)
    assert jnp.allclose(out_bf16, ref, atol=3e-2, rtol=3e-2), "bf16 path mismatch"

    # --- Test 2: unaligned sizes, batch tiled into 2 grid steps -------------
    B2, I2, H2 = 16, 24, 40
    k1, k2, k3, key = jax.random.split(key, 4)
    x2 = jax.random.normal(k1, (B2, I2), jnp.float32)
    h2 = jax.random.normal(k2, (B2, H2), jnp.float32)
    p2 = init_params(k3, I2, H2)
    ref2 = gru_cell_ref(x2, h2, *p2)
    out2 = jax.block_until_ready(gru_cell(x2, h2, *p2, mxu_dtype=jnp.float32))
    assert out2.shape == (B2, H2)
    assert jnp.allclose(out2, ref2, atol=1e-4, rtol=1e-4), "tiled-batch mismatch"

    # --- Test 3: forced gate/column-axis tiling (nh > 1 path) ---------------
    B3, I3, H3 = 16, 24, 256
    k1, k2, k3 = jax.random.split(key, 3)
    x3 = jax.random.normal(k1, (B3, I3), jnp.float32)
    h3 = jax.random.normal(k2, (B3, H3), jnp.float32)
    p3 = init_params(k3, I3, H3)
    ref3 = gru_cell_ref(x3, h3, *p3)
    packed3, dims3 = pack_gru_params(*p3, mxu_dtype=jnp.float32, col_tile=128)
    assert dims3[3] // dims3[4] == 2  # nh == 2
    out3 = jax.block_until_ready(gru_cell_packed(x3, h3, packed3, dims3))
    assert out3.shape == (B3, H3)
    assert jnp.allclose(out3, ref3, atol=1e-4, rtol=1e-4), "column-tiled mismatch"

    print("KERNEL_OK")
</pallas_src>

<mosaic_0001>
module attributes {stable_mosaic.version = 11 : i64} {
  func.func @_gru_kernel(%arg0: i32, %arg1: i32, %arg2: memref<8x256xf32, #tpu.memory_space<vmem>>, %arg3: memref<256x256xf32, #tpu.memory_space<vmem>>, %arg4: memref<1x256xf32, #tpu.memory_space<vmem>>, %arg5: memref<128x128xf32, #tpu.memory_space<vmem>>, %arg6: memref<1x128xf32, #tpu.memory_space<vmem>>, %arg7: memref<128x128xf32, #tpu.memory_space<vmem>>, %arg8: memref<1x128xf32, #tpu.memory_space<vmem>>, %arg9: memref<8x128xf32, #tpu.memory_space<vmem>>) attributes {dimension_semantics = [#tpu.dimension_semantics<parallel>, #tpu.dimension_semantics<arbitrary>], iteration_bounds = array<i64: 1, 1>, scalar_prefetch = 0 : i64, scratch_operands = 0 : i64, tpu.core_type = #tpu.core_type<tc>, window_params = [{transform_indices = @transform_0, window_bounds = array<i64: 8, 256>}, {pipeline_mode = #tpu.pipeline_mode<synchronous>, transform_indices = @transform_1, window_bounds = array<i64: 256, 256>}, {pipeline_mode = #tpu.pipeline_mode<synchronous>, transform_indices = @transform_2, window_bounds = array<i64: 1, 256>}, {pipeline_mode = #tpu.pipeline_mode<synchronous>, transform_indices = @transform_3, window_bounds = array<i64: 128, 128>}, {pipeline_mode = #tpu.pipeline_mode<synchronous>, transform_indices = @transform_4, window_bounds = array<i64: 1, 128>}, {pipeline_mode = #tpu.pipeline_mode<synchronous>, transform_indices = @transform_5, window_bounds = array<i64: 128, 128>}, {pipeline_mode = #tpu.pipeline_mode<synchronous>, transform_indices = @transform_6, window_bounds = array<i64: 1, 128>}, {transform_indices = @transform_7, window_bounds = array<i64: 8, 128>}]} {
    %c0 = arith.constant 0 : index
    %c0_0 = arith.constant 0 : index
    %0 = vector.load %arg2[%c0, %c0_0] : memref<8x256xf32, #tpu.memory_space<vmem>>, vector<8x256xf32>
    %1 = vector.extract_strided_slice %0 {offsets = [0, 0], sizes = [8, 128], strides = [1, 1]} : vector<8x256xf32> to vector<8x128xf32>
    %2 = vector.extract_strided_slice %0 {offsets = [0, 128], sizes = [8, 128], strides = [1, 1]} : vector<8x256xf32> to vector<8x128xf32>
    %c0_1 = arith.constant 0 : index
    %c0_2 = arith.constant 0 : index
    %3 = vector.load %arg3[%c0_1, %c0_2] : memref<256x256xf32, #tpu.memory_space<vmem>>, vector<256x256xf32>
    %cst = arith.constant dense<0.000000e+00> : vector<8x256xf32>
    %4 = tpu.matmul %0, %3, %cst {dimension_numbers = #tpu.dot_dimension_numbers<[1], [0], [0], [1], [0, 0, 1, 1], [], []>} : vector<8x256xf32>, vector<256x256xf32>, vector<8x256xf32> -> vector<8x256xf32>
    %c0_3 = arith.constant 0 : index
    %c0_4 = arith.constant 0 : index
    %5 = vector.load %arg4[%c0_3, %c0_4] : memref<1x256xf32, #tpu.memory_space<vmem>>, vector<1x256xf32>
    %6 = vector.broadcast %5 : vector<1x256xf32> to vector<8x256xf32>
    %7 = arith.addf %4, %6 : vector<8x256xf32>
    %8 = vector.extract_strided_slice %7 {offsets = [0, 0], sizes = [8, 128], strides = [1, 1]} : vector<8x256xf32> to vector<8x128xf32>
    %9 = arith.negf %8 : vector<8x128xf32>
    %10 = math.exp %9 : vector<8x128xf32>
    %cst_5 = arith.constant 1.000000e+00 : f32
    %11 = vector.broadcast %cst_5 : f32 to vector<8x128xf32>
    %12 = arith.addf %11, %10 : vector<8x128xf32>
    %13 = arith.divf %11, %12 : vector<8x128xf32>
    %14 = vector.extract_strided_slice %7 {offsets = [0, 128], sizes = [8, 128], strides = [1, 1]} : vector<8x256xf32> to vector<8x128xf32>
    %15 = arith.negf %14 : vector<8x128xf32>
    %16 = math.exp %15 : vector<8x128xf32>
    %cst_6 = arith.constant 1.000000e+00 : f32
    %17 = vector.broadcast %cst_6 : f32 to vector<8x128xf32>
    %18 = arith.addf %17, %16 : vector<8x128xf32>
    %19 = arith.divf %17, %18 : vector<8x128xf32>
    %c0_7 = arith.constant 0 : index
    %c0_8 = arith.constant 0 : index
    %20 = vector.load %arg5[%c0_7, %c0_8] : memref<128x128xf32, #tpu.memory_space<vmem>>, vector<128x128xf32>
    %cst_9 = arith.constant dense<0.000000e+00> : vector<8x128xf32>
    %21 = tpu.matmul %1, %20, %cst_9 {dimension_numbers = #tpu.dot_dimension_numbers<[1], [0], [0], [1], [0, 0, 1, 1], [], []>} : vector<8x128xf32>, vector<128x128xf32>, vector<8x128xf32> -> vector<8x128xf32>
    %c0_10 = arith.constant 0 : index
    %c0_11 = arith.constant 0 : index
    %22 = vector.load %arg6[%c0_10, %c0_11] : memref<1x128xf32, #tpu.memory_space<vmem>>, vector<1x128xf32>
    %23 = vector.broadcast %22 : vector<1x128xf32> to vector<8x128xf32>
    %24 = arith.addf %21, %23 : vector<8x128xf32>
    %c0_12 = arith.constant 0 : index
    %c0_13 = arith.constant 0 : index
    %25 = vector.load %arg7[%c0_12, %c0_13] : memref<128x128xf32, #tpu.memory_space<vmem>>, vector<128x128xf32>
    %cst_14 = arith.constant dense<0.000000e+00> : vector<8x128xf32>
    %26 = tpu.matmul %2, %25, %cst_14 {dimension_numbers = #tpu.dot_dimension_numbers<[1], [0], [0], [1], [0, 0, 1, 1], [], []>} : vector<8x128xf32>, vector<128x128xf32>, vector<8x128xf32> -> vector<8x128xf32>
    %c0_15 = arith.constant 0 : index
    %c0_16 = arith.constant 0 : index
    %27 = vector.load %arg8[%c0_15, %c0_16] : memref<1x128xf32, #tpu.memory_space<vmem>>, vector<1x128xf32>
    %28 = vector.broadcast %27 : vector<1x128xf32> to vector<8x128xf32>
    %29 = arith.addf %26, %28 : vector<8x128xf32>
    %30 = arith.mulf %13, %29 : vector<8x128xf32>
    %31 = arith.addf %24, %30 : vector<8x128xf32>
    %32 = math.tanh %31 : vector<8x128xf32>
    %c128_i32 = arith.constant 128 : i32
    %33 = arith.muli %arg1, %c128_i32 : i32
    %c128_i32_17 = arith.constant 128 : i32
    %34 = arith.addi %c128_i32_17, %33 : i32
    %35 = tpu.assume_multiple %34, 128 : i32
    %c0_18 = arith.constant 0 : index
    %36 = arith.index_cast %35 : i32 to index
    %37 = vector.load %arg2[%c0_18, %36] : memref<8x256xf32, #tpu.memory_space<vmem>>, vector<8x128xf32>
    %38 = arith.mulf %19, %37 : vector<8x128xf32>
    %cst_19 = arith.constant 1.000000e+00 : f32
    %39 = vector.broadcast %cst_19 : f32 to vector<8x128xf32>
    %40 = arith.subf %39, %19 : vector<8x128xf32>
    %41 = arith.mulf %40, %32 : vector<8x128xf32>
    %42 = arith.addf %38, %41 : vector<8x128xf32>
    %c0_20 = arith.constant 0 : index
    %c0_21 = arith.constant 0 : index
    %43 = vector.load %arg9[%c0_20, %c0_21] : memref<8x128xf32, #tpu.memory_space<vmem>>, vector<8x128xf32>
    tpu.vector_store %arg9[%c0_20, %c0_21], %42 {strides = array<i32>} : memref<8x128xf32, #tpu.memory_space<vmem>>, vector<8x128xf32>,
    return
  }
  func.func @transform_0(%arg0: i32, %arg1: i32) -> (i32, i32) {
    %c0_i32 = arith.constant 0 : i32
    %c0_i32_0 = arith.constant 0 : i32
    return %arg0, %c0_i32 : i32, i32
  }
  func.func @transform_1(%arg0: i32, %arg1: i32) -> (i32, i32) {
    %c0_i32 = arith.constant 0 : i32
    %c0_i32_0 = arith.constant 0 : i32
    return %c0_i32, %arg1 : i32, i32
  }
  func.func @transform_2(%arg0: i32, %arg1: i32) -> (i32, i32) {
    %c0_i32 = arith.constant 0 : i32
    %c0_i32_0 = arith.constant 0 : i32
    return %c0_i32, %arg1 : i32, i32
  }
  func.func @transform_3(%arg0: i32, %arg1: i32) -> (i32, i32) {
    %c0_i32 = arith.constant 0 : i32
    %c0_i32_0 = arith.constant 0 : i32
    return %c0_i32, %arg1 : i32, i32
  }
  func.func @transform_4(%arg0: i32, %arg1: i32) -> (i32, i32) {
    %c0_i32 = arith.constant 0 : i32
    %c0_i32_0 = arith.constant 0 : i32
    return %c0_i32, %arg1 : i32, i32
  }
  func.func @transform_5(%arg0: i32, %arg1: i32) -> (i32, i32) {
    %c0_i32 = arith.constant 0 : i32
    %c0_i32_0 = arith.constant 0 : i32
    return %c0_i32, %arg1 : i32, i32
  }
  func.func @transform_6(%arg0: i32, %arg1: i32) -> (i32, i32) {
    %c0_i32 = arith.constant 0 : i32
    %c0_i32_0 = arith.constant 0 : i32
    return %c0_i32, %arg1 : i32, i32
  }
  func.func @transform_7(%arg0: i32, %arg1: i32) -> (i32, i32) {
    %c0_i32 = arith.constant 0 : i32
    return %arg0, %arg1 : i32, i32
  }
}

module attributes {stable_mosaic.version = 11 : i64} {
  func.func @_gru_kernel(%arg0: i32, %arg1: i32, %arg2: memref<8x256xf32, #tpu.memory_space<vmem>>, %arg3: memref<256x256xf32, #tpu.memory_space<vmem>>, %arg4: memref<1x256xf32, #tpu.memory_space<vmem>>, %arg5: memref<128x128xf32, #tpu.memory_space<vmem>>, %arg6: memref<1x128xf32, #tpu.memory_space<vmem>>, %arg7: memref<128x128xf32, #tpu.memory_space<vmem>>, %arg8: memref<1x128xf32, #tpu.memory_space<vmem>>, %arg9: memref<8x128xf32, #tpu.memory_space<vmem>>) attributes {dimension_semantics = [#tpu.dimension_semantics<parallel>, #tpu.dimension_semantics<arbitrary>], iteration_bounds = array<i64: 1, 1>, scalar_prefetch = 0 : i64, scratch_operands = 0 : i64, tpu.core_type = #tpu.core_type<tc>, window_params = [{transform_indices = @transform_0, window_bounds = array<i64: 8, 256>}, {transform_indices = @transform_1, window_bounds = array<i64: 256, 256>}, {transform_indices = @transform_2, window_bounds = array<i64: 1, 256>}, {transform_indices = @transform_3, window_bounds = array<i64: 128, 128>}, {transform_indices = @transform_4, window_bounds = array<i64: 1, 128>}, {transform_indices = @transform_5, window_bounds = array<i64: 128, 128>}, {transform_indices = @transform_6, window_bounds = array<i64: 1, 128>}, {transform_indices = @transform_7, window_bounds = array<i64: 8, 128>}]} {
    %c0 = arith.constant 0 : index
    %c0_0 = arith.constant 0 : index
    %0 = vector.load %arg2[%c0, %c0_0] : memref<8x256xf32, #tpu.memory_space<vmem>>, vector<8x256xf32>
    %1 = vector.extract_strided_slice %0 {offsets = [0, 0], sizes = [8, 128], strides = [1, 1]} : vector<8x256xf32> to vector<8x128xf32>
    %2 = vector.extract_strided_slice %0 {offsets = [0, 128], sizes = [8, 128], strides = [1, 1]} : vector<8x256xf32> to vector<8x128xf32>
    %c0_1 = arith.constant 0 : index
    %c0_2 = arith.constant 0 : index
    %3 = vector.load %arg3[%c0_1, %c0_2] : memref<256x256xf32, #tpu.memory_space<vmem>>, vector<256x256xf32>
    %cst = arith.constant dense<0.000000e+00> : vector<8x256xf32>
    %4 = tpu.matmul %0, %3, %cst {dimension_numbers = #tpu.dot_dimension_numbers<[1], [0], [0], [1], [0, 0, 1, 1], [], []>} : vector<8x256xf32>, vector<256x256xf32>, vector<8x256xf32> -> vector<8x256xf32>
    %c0_3 = arith.constant 0 : index
    %c0_4 = arith.constant 0 : index
    %5 = vector.load %arg4[%c0_3, %c0_4] : memref<1x256xf32, #tpu.memory_space<vmem>>, vector<1x256xf32>
    %6 = vector.broadcast %5 : vector<1x256xf32> to vector<8x256xf32>
    %7 = arith.addf %4, %6 : vector<8x256xf32>
    %8 = vector.extract_strided_slice %7 {offsets = [0, 0], sizes = [8, 128], strides = [1, 1]} : vector<8x256xf32> to vector<8x128xf32>
    %9 = arith.negf %8 : vector<8x128xf32>
    %10 = math.exp %9 : vector<8x128xf32>
    %cst_5 = arith.constant 1.000000e+00 : f32
    %11 = vector.broadcast %cst_5 : f32 to vector<8x128xf32>
    %12 = arith.addf %11, %10 : vector<8x128xf32>
    %13 = arith.divf %11, %12 : vector<8x128xf32>
    %14 = vector.extract_strided_slice %7 {offsets = [0, 128], sizes = [8, 128], strides = [1, 1]} : vector<8x256xf32> to vector<8x128xf32>
    %15 = arith.negf %14 : vector<8x128xf32>
    %16 = math.exp %15 : vector<8x128xf32>
    %cst_6 = arith.constant 1.000000e+00 : f32
    %17 = vector.broadcast %cst_6 : f32 to vector<8x128xf32>
    %18 = arith.addf %17, %16 : vector<8x128xf32>
    %19 = arith.divf %17, %18 : vector<8x128xf32>
    %c0_7 = arith.constant 0 : index
    %c0_8 = arith.constant 0 : index
    %20 = vector.load %arg5[%c0_7, %c0_8] : memref<128x128xf32, #tpu.memory_space<vmem>>, vector<128x128xf32>
    %cst_9 = arith.constant dense<0.000000e+00> : vector<8x128xf32>
    %21 = tpu.matmul %1, %20, %cst_9 {dimension_numbers = #tpu.dot_dimension_numbers<[1], [0], [0], [1], [0, 0, 1, 1], [], []>} : vector<8x128xf32>, vector<128x128xf32>, vector<8x128xf32> -> vector<8x128xf32>
    %c0_10 = arith.constant 0 : index
    %c0_11 = arith.constant 0 : index
    %22 = vector.load %arg6[%c0_10, %c0_11] : memref<1x128xf32, #tpu.memory_space<vmem>>, vector<1x128xf32>
    %23 = vector.broadcast %22 : vector<1x128xf32> to vector<8x128xf32>
    %24 = arith.addf %21, %23 : vector<8x128xf32>
    %c0_12 = arith.constant 0 : index
    %c0_13 = arith.constant 0 : index
    %25 = vector.load %arg7[%c0_12, %c0_13] : memref<128x128xf32, #tpu.memory_space<vmem>>, vector<128x128xf32>
    %cst_14 = arith.constant dense<0.000000e+00> : vector<8x128xf32>
    %26 = tpu.matmul %2, %25, %cst_14 {dimension_numbers = #tpu.dot_dimension_numbers<[1], [0], [0], [1], [0, 0, 1, 1], [], []>} : vector<8x128xf32>, vector<128x128xf32>, vector<8x128xf32> -> vector<8x128xf32>
    %c0_15 = arith.constant 0 : index
    %c0_16 = arith.constant 0 : index
    %27 = vector.load %arg8[%c0_15, %c0_16] : memref<1x128xf32, #tpu.memory_space<vmem>>, vector<1x128xf32>
    %28 = vector.broadcast %27 : vector<1x128xf32> to vector<8x128xf32>
    %29 = arith.addf %26, %28 : vector<8x128xf32>
    %30 = arith.mulf %13, %29 : vector<8x128xf32>
    %31 = arith.addf %24, %30 : vector<8x128xf32>
    %32 = math.tanh %31 : vector<8x128xf32>
    %c128_i32 = arith.constant 128 : i32
    %33 = arith.muli %arg1, %c128_i32 : i32
    %c128_i32_17 = arith.constant 128 : i32
    %34 = arith.addi %c128_i32_17, %33 : i32
    %35 = tpu.assume_multiple %34, 128 : i32
    %c0_18 = arith.constant 0 : index
    %36 = arith.index_cast %35 : i32 to index
    %37 = vector.load %arg2[%c0_18, %36] : memref<8x256xf32, #tpu.memory_space<vmem>>, vector<8x128xf32>
    %38 = arith.mulf %19, %37 : vector<8x128xf32>
    %cst_19 = arith.constant 1.000000e+00 : f32
    %39 = vector.broadcast %cst_19 : f32 to vector<8x128xf32>
    %40 = arith.subf %39, %19 : vector<8x128xf32>
    %41 = arith.mulf %40, %32 : vector<8x128xf32>
    %42 = arith.addf %38, %41 : vector<8x128xf32>
    %c0_20 = arith.constant 0 : index
    %c0_21 = arith.constant 0 : index
    %43 = vector.load %arg9[%c0_20, %c0_21] : memref<8x128xf32, #tpu.memory_space<vmem>>, vector<8x128xf32>
    tpu.vector_store %arg9[%c0_20, %c0_21], %42 {strides = array<i32>} : memref<8x128xf32, #tpu.memory_space<vmem>>, vector<8x128xf32>,
    return
  }
  func.func @transform_0(%arg0: i32, %arg1: i32) -> (i32, i32) {
    %c0_i32 = arith.constant 0 : i32
    %c0_i32_0 = arith.constant 0 : i32
    return %arg0, %c0_i32 : i32, i32
  }
  func.func @transform_1(%arg0: i32, %arg1: i32) -> (i32, i32) {
    %c0_i32 = arith.constant 0 : i32
    %c0_i32_0 = arith.constant 0 : i32
    return %c0_i32, %arg1 : i32, i32
  }
  func.func @transform_2(%arg0: i32, %arg1: i32) -> (i32, i32) {
    %c0_i32 = arith.constant 0 : i32
    %c0_i32_0 = arith.constant 0 : i32
    return %c0_i32, %arg1 : i32, i32
  }
  func.func @transform_3(%arg0: i32, %arg1: i32) -> (i32, i32) {
    %c0_i32 = arith.constant 0 : i32
    %c0_i32_0 = arith.constant 0 : i32
    return %c0_i32, %arg1 : i32, i32
  }
  func.func @transform_4(%arg0: i32, %arg1: i32) -> (i32, i32) {
    %c0_i32 = arith.constant 0 : i32
    %c0_i32_0 = arith.constant 0 : i32
    return %c0_i32, %arg1 : i32, i32
  }
  func.func @transform_5(%arg0: i32, %arg1: i32) -> (i32, i32) {
    %c0_i32 = arith.constant 0 : i32
    %c0_i32_0 = arith.constant 0 : i32
    return %c0_i32, %arg1 : i32, i32
  }
  func.func @transform_6(%arg0: i32, %arg1: i32) -> (i32, i32) {
    %c0_i32 = arith.constant 0 : i32
    %c0_i32_0 = arith.constant 0 : i32
    return %c0_i32, %arg1 : i32, i32
  }
  func.func @transform_7(%arg0: i32, %arg1: i32) -> (i32, i32) {
    %c0_i32 = arith.constant 0 : i32
    return %arg0, %arg1 : i32, i32
  }
}

</mosaic_0001>

<bundles_post_ra>
// kernel: tpu_custom_call.1
= control target key start
LH: loop header
LB: loop body
LE: loop exit
PB: predicated region body
PF: predicated region fallthrough
CT: control target
= control target key end

     0   :  { %12 = vsyncpa [#allocation3], 0  ;;  %s818_s0 = inlined_call_operand.hbm [shape: f32[8,256], index: 0, kind: input, shape index: {}]   ;;  %s819_s1 = inlined_call_operand.hbm [shape: f32[256,256], index: 1, kind: input, shape index: {}]   ;;  %s820_s2 = inlined_call_operand.vmem [shape: f32[1,256], index: 2, kind: input, shape index: {}]   ;;  %s821_s3 = inlined_call_operand.hbm [shape: f32[128,128], index: 3, kind: input, shape index: {}]   ;;  %s822_s4 = inlined_call_operand.vmem [shape: f32[1,128], index: 4, kind: input, shape index: {}]   ;;  %s823_s5 = inlined_call_operand.hbm [shape: f32[128,128], index: 5, kind: input, shape index: {}]   ;;  %s824_s6 = inlined_call_operand.vmem [shape: f32[1,128], index: 6, kind: input, shape index: {}]   ;;  %s825_s7 = inlined_call_operand.hbm [shape: f32[8,128], index: 7, kind: output, shape index: {}]  }
   0x1   :  { %13 = vsyncpa [#allocation6], 0 }
   0x2   :  { %14 = vsyncpa [#allocation9], 0 }
   0x3   :  { %15 = vsyncpa [#allocation4], 0  ;;  %s698_s24 = smov [#allocation5]  }
   0x4   :  { %s31_s25 = sshll.u32 %s698_s24, 4  ;;  %s32_s25 = int_to_ptr.vmem [resolvable:$true] %s31_s25 }
   0x5   :  { %s598_s26 = scalar_lea.vmem %s32_s25, 8192  ;;  %p603_p1 = scmp.lt.s32.totalorder %s32_s25, %s32_s25 }
   0x6   :  { %p599_p0 = scmp.ne.s32.totalorder %s32_s25, %s598_s26  ;;  %p604_p2 = scmp.lt.s32.totalorder %s598_s26, %s598_s26 }
   0x8   :  { %p605_p3 = por %p604_p2, %p603_p1 }
   0xa   :  { %p606_p4 = pnand %p605_p3, %p599_p0 }
   0xc   :  { %609 = shalt.err (!%p606_p4)
}
   0xd   :  { %s699_s27 = smov 256   ;;  %s700_s28 = smov 16  }
   0xe   :  { %37 = dma.hbm_to_vmem [thread:$0]  %s819_s1, 8192, %s32_s25, [#allocation6], %s699_s27, %s699_s27, %s700_s28  }
   0xf   :  { %s701_s8 = smov [#allocation2]   ;;  %s702_s10 = smov [#allocation7]  }
  0x10   :  { %s22_s9 = sshll.u32 %s701_s8, 4  ;;  %s45_s11 = sshll.u32 %s702_s10, 4  ;;  %s23_s9 = int_to_ptr.vmem [resolvable:$true] %s22_s9  ;;  %s46_s11 = int_to_ptr.vmem [resolvable:$true] %s45_s11 }
  0x11   :  { %s618_s12 = scalar_lea.vmem %s23_s9, 256  ;;  %p623_p6 = scmp.lt.s32.totalorder %s23_s9, %s23_s9 }
  0x12   :  { %p619_p5 = scmp.ne.s32.totalorder %s23_s9, %s618_s12  ;;  %p624_p7 = scmp.lt.s32.totalorder %s618_s12, %s618_s12 }
  0x14   :  { %p625_p8 = por %p624_p7, %p623_p6 }
  0x16   :  { %p626_p9 = pnand %p625_p8, %p619_p5 }
  0x18   :  { %629 = shalt.err (!%p626_p9)
}
  0x19   :  { %25 = dma.hbm_to_vmem [thread:$0]  %s818_s0, 256, %s23_s9, [#allocation3]  }
  0x1a   :  { %s638_s15 = scalar_lea.vmem %s46_s11, 2048  ;;  %p643_p11 = scmp.lt.s32.totalorder %s46_s11, %s46_s11 }
  0x1b   :  { %p639_p10 = scmp.ne.s32.totalorder %s46_s11, %s638_s15  ;;  %p644_p12 = scmp.lt.s32.totalorder %s638_s15, %s638_s15 }
  0x1d   :  { %p645_p13 = por %p644_p12, %p643_p11 }
  0x1f   :  { %p646_p0 = pnand %p645_p13, %p639_p10 }
  0x21   :  { %649 = shalt.err (!%p646_p0)
}
  0x22   :  { %s703_s1 = smov 128   ;;  %s704_s16 = smov 8  }
  0x23   :  { %51 = dma.hbm_to_vmem [thread:$0]  %s821_s3, 2048, %s46_s11, [#allocation6], %s703_s1, %s703_s1, %s704_s16  }
  0x24   :  { %s705_s19 = smov [#allocation8]  }
  0x25   :  { %s59_s20 = sshll.u32 %s705_s19, 4  ;;  %s60_s20 = int_to_ptr.vmem [resolvable:$true] %s59_s20 }
  0x26   :  { %s658_s21 = scalar_lea.vmem %s60_s20, 2048  ;;  %p663_p2 = scmp.lt.s32.totalorder %s60_s20, %s60_s20 }
  0x27   :  { %p659_p1 = scmp.ne.s32.totalorder %s60_s20, %s658_s21  ;;  %p664_p3 = scmp.lt.s32.totalorder %s658_s21, %s658_s21 }
  0x29   :  { %p665_p4 = por %p664_p3, %p663_p2 }
  0x2b   :  { %p666_p5 = pnand %p665_p4, %p659_p1 }
  0x2d   :  { %669 = shalt.err (!%p666_p5)
}
  0x2e   :  { %65 = dma.hbm_to_vmem [thread:$0]  %s823_s5, 2048, %s60_s20, [#allocation9], %s703_s1, %s703_s1, %s704_s16  }
  0x2f   :  { %690 = dma.done.wait [#allocation3], 256  }
  0x30   :  { %691 = vsyncadd [#allocation3], 4294967040 }
  0x31   :  { %692 = dma.done.wait [#allocation6], 10240  }
  0x32   :  { %693 = vsyncadd [#allocation6], 4294957056 }
  0x33   :  { %694 = dma.done.wait [#allocation9], 2048  }
  0x34   :  { %695 = vsyncadd [#allocation9], 4294965248  ;;  %v706_v0 = vmov 0.0   ;;  %vm707_vm0 = vmmov 0   ;;  %v113_v1 = vld [vmem:[#allocation5 + $0xf8] sm:$0xff]  ;;  %v112_v2 = vld [vmem:[#allocation5 + $0xf0] sm:$0xff] }
  0x35   :  { %499 = vmatprep.subr.mxu1 %v706_v0  ;;  %531 = vmatprep.mubr.msk.f32.mxu1 %vm707_vm0, %v706_v0  ;;  %v111_v3 = vld [vmem:[#allocation5 + $0xe8] sm:$0xff]  ;;  %v110_v4 = vld [vmem:[#allocation5 + $0xe0] sm:$0xff]  ;;  %v109_v5 = vld [vmem:[#allocation5 + $0xd8] sm:$0xff]  ;;  %s708_s26 = smov [#allocation10]  }
  0x36   :  { %158 = vmatprep.subr.mxu0 %v113_v1  ;;  %v108_v6 = vld [vmem:[#allocation5 + $0xd0] sm:$0xff]  ;;  %v107_v7 = vld [vmem:[#allocation5 + $0xc8] sm:$0xff]  ;;  %v106_v8 = vld [vmem:[#allocation5 + $0xc0] sm:$0xff]  ;;  %s448_s27 = sshll.u32 %s708_s26, 4  ;;  %s449_s27 = int_to_ptr.vmem [resolvable:$true] %s448_s27 }
  0x37   :  { %159 = vmatpush1.msra.mxu0 %v112_v2  ;;  %v105_v9 = vld [vmem:[#allocation5 + $0xb8] sm:$0xff]  ;;  %v104_v10 = vld [vmem:[#allocation5 + $0xb0] sm:$0xff]  ;;  %v103_v11 = vld [vmem:[#allocation5 + $0xa8] sm:$0xff]  ;;  %p675_p7 = scmp.lt.s32.totalorder %s449_s27, %s449_s27 }
  0x38   :  { %160 = vmatprep.subr.mxu0 %v111_v3  ;;  %v102_v12 = vld [vmem:[#allocation5 + $0xa0] sm:$0xff]  ;;  %v101_v13 = vld [vmem:[#allocation5 + $0x98] sm:$0xff]  ;;  %v100_v15 = vld [vmem:[#allocation5 + $0x90] sm:$0xff] }
  0x39   :  { %161 = vmatpush1.msra.mxu0 %v110_v4  ;;  %v256_v14 = vld [vmem:[#allocation7 + $0x78] sm:$0xff]  ;;  %v255_v16 = vld [vmem:[#allocation7 + $0x70] sm:$0xff]  ;;  %v99_v17 = vld [vmem:[#allocation5 + $0x88] sm:$0xff] }
  0x3a   :  { %162 = vmatprep.subr.mxu0 %v109_v5  ;;  %500 = vmatpush3.msra.mxu1 %v256_v14  ;;  %v254_v18 = vld [vmem:[#allocation7 + $0x68] sm:$0xff]  ;;  %v98_v19 = vld [vmem:[#allocation5 + $0x80] sm:$0xff]  ;;  %v97_v20 = vld [vmem:[#allocation5 + $0x78] sm:$0xff] }
  0x3b   :  { %163 = vmatpush1.msra.mxu0 %v108_v6  ;;  %501 = vmatprep.subr.mxu1 %v706_v0  ;;  %v253_v21 = vld [vmem:[#allocation7 + $0x60] sm:$0xff]  ;;  %v96_v22 = vld [vmem:[#allocation5 + $0x70] sm:$0xff]  ;;  %v95_v23 = vld [vmem:[#allocation5 + $0x68] sm:$0xff] }
  0x3c   :  { %164 = vmatprep.subr.mxu0 %v107_v7  ;;  %502 = vmatpush3.msra.mxu1 %v255_v16  ;;  %v252_v24 = vld [vmem:[#allocation7 + $0x58] sm:$0xff]  ;;  %v94_v25 = vld [vmem:[#allocation5 + $0x60] sm:$0xff]  ;;  %v251_v27 = vld [vmem:[#allocation7 + $0x50] sm:$0xff] }
  0x3d   :  { %165 = vmatpush1.msra.mxu0 %v106_v8  ;;  %503 = vmatprep.subr.mxu1 %v706_v0  ;;  %v93_v26 = vld [vmem:[#allocation5 + $0x58] sm:$0xff]  ;;  %v92_v28 = vld [vmem:[#allocation5 + $0x50] sm:$0xff]  ;;  %v91_v29 = vld [vmem:[#allocation5 + $0x48] sm:$0xff] }
  0x3e   :  { %166 = vmatprep.subr.mxu0 %v105_v9  ;;  %504 = vmatpush3.msra.mxu1 %v254_v18  ;;  %v250_v30 = vld [vmem:[#allocation7 + $0x48] sm:$0xff]  ;;  %v90_v31 = vld [vmem:[#allocation5 + $0x40] sm:$0xff]  ;;  %v89_v32 = vld [vmem:[#allocation5 + $0x38] sm:$0xff] }
  0x3f   :  { %167 = vmatpush1.msra.mxu0 %v104_v10  ;;  %505 = vmatprep.subr.mxu1 %v706_v0  ;;  %v249_v33 = vld [vmem:[#allocation7 + $0x40] sm:$0xff]  ;;  %v88_v34 = vld [vmem:[#allocation5 + $0x30] sm:$0xff]  ;;  %v87_v35 = vld [vmem:[#allocation5 + $0x28] sm:$0xff] }
  0x40   :  { %168 = vmatprep.subr.mxu0 %v103_v11  ;;  %506 = vmatpush3.msra.mxu1 %v253_v21  ;;  %v248_v36 = vld [vmem:[#allocation7 + $0x38] sm:$0xff]  ;;  %v86_v37 = vld [vmem:[#allocation5 + $0x20] sm:$0xff]  ;;  %v247_v39 = vld [vmem:[#allocation7 + $0x30] sm:$0xff] }
  0x41   :  { %169 = vmatpush1.msra.mxu0 %v102_v12  ;;  %507 = vmatprep.subr.mxu1 %v706_v0  ;;  %v85_v38 = vld [vmem:[#allocation5 + $0x18] sm:$0xff]  ;;  %v84_v40 = vld [vmem:[#allocation5 + $0x10] sm:$0xff]  ;;  %v83_v41 = vld [vmem:[#allocation5 + $0x8] sm:$0xff] }
  0x42   :  { %170 = vmatprep.subr.mxu0 %v101_v13  ;;  %508 = vmatpush3.msra.mxu1 %v252_v24  ;;  %v246_v42 = vld [vmem:[#allocation7 + $0x28] sm:$0xff]  ;;  %v82_v43 = vld [vmem:[#allocation5] sm:$0xff]  ;;  %v145_v44 = vld [vmem:[#allocation5 + $0x1f8] sm:$0xff] }
  0x43   :  { %171 = vmatpush1.msra.mxu0 %v100_v15  ;;  %509 = vmatprep.subr.mxu1 %v706_v0  ;;  %v245_v45 = vld [vmem:[#allocation7 + $0x20] sm:$0xff]  ;;  %v144_v46 = vld [vmem:[#allocation5 + $0x1f0] sm:$0xff]  ;;  %v143_v47 = vld [vmem:[#allocation5 + $0x1e8] sm:$0xff] }
  0x44   :  { %172 = vmatprep.subr.mxu0 %v99_v17  ;;  %510 = vmatpush3.msra.mxu1 %v251_v27  ;;  %v244_v48 = vld [vmem:[#allocation7 + $0x18] sm:$0xff]  ;;  %v142_v49 = vld [vmem:[#allocation5 + $0x1e0] sm:$0xff]  ;;  %v243_v51 = vld [vmem:[#allocation7 + $0x10] sm:$0xff] }
  0x45   :  { %173 = vmatpush1.msra.mxu0 %v98_v19  ;;  %511 = vmatprep.subr.mxu1 %v706_v0  ;;  %v141_v50 = vld [vmem:[#allocation5 + $0x1d8] sm:$0xff]  ;;  %v140_v52 = vld [vmem:[#allocation5 + $0x1d0] sm:$0xff]  ;;  %v139_v53 = vld [vmem:[#allocation5 + $0x1c8] sm:$0xff] }
  0x46   :  { %174 = vmatprep.subr.mxu0 %v97_v20  ;;  %512 = vmatpush3.msra.mxu1 %v250_v30  ;;  %v242_v54 = vld [vmem:[#allocation7 + $0x8] sm:$0xff]  ;;  %v138_v55 = vld [vmem:[#allocation5 + $0x1c0] sm:$0xff]  ;;  %v137_v56 = vld [vmem:[#allocation5 + $0x1b8] sm:$0xff] }
  0x47   :  { %175 = vmatpush1.msra.mxu0 %v96_v22  ;;  %513 = vmatprep.subr.mxu1 %v706_v0  ;;  %v241_v57 = vld [vmem:[#allocation7] sm:$0xff]  ;;  %v136_v58 = vld [vmem:[#allocation5 + $0x1b0] sm:$0xff]  ;;  %v135_v59 = vld [vmem:[#allocation5 + $0x1a8] sm:$0xff] }
  0x48   :  { %176 = vmatprep.subr.mxu0 %v95_v23  ;;  %514 = vmatpush3.msra.mxu1 %v249_v33  ;;  %v779_v60 = vld [vmem:[#allocation2 + $0x8] sm:$0xff]  ;;  %v134_v61 = vld [vmem:[#allocation5 + $0x1a0] sm:$0xff]  ;;  %v781_v62 = vld [vmem:[#allocation2] sm:$0xff] }
  0x49   :  { %177 = vmatpush1.msra.mxu0 %v94_v25  ;;  %515 = vmatprep.subr.mxu1 %v706_v0  ;;  %v133_v63 = vld [vmem:[#allocation5 + $0x198] sm:$0xff]  ;;  %v132_v2 = vld [vmem:[#allocation5 + $0x190] sm:$0xff]  ;;  %v131_v3 = vld [vmem:[#allocation5 + $0x188] sm:$0xff] }
  0x4a   :  { %178 = vmatprep.subr.mxu0 %v93_v26  ;;  %516 = vmatpush3.msra.mxu1 %v248_v36  ;;  %v349_v1 = vld [vmem:[#allocation8 + $0x78] sm:$0xff]  ;;  %v348_v4 = vld [vmem:[#allocation8 + $0x70] sm:$0xff]  ;;  %v130_v5 = vld [vmem:[#allocation5 + $0x180] sm:$0xff] }
  0x4b   :  { %179 = vmatpush1.msra.mxu0 %v92_v28  ;;  %517 = vmatprep.subr.mxu1 %v706_v0  ;;  %v129_v6 = vld [vmem:[#allocation5 + $0x178] sm:$0xff]  ;;  %v347_v7 = vld [vmem:[#allocation8 + $0x68] sm:$0xff]  ;;  %v128_v8 = vld [vmem:[#allocation5 + $0x170] sm:$0xff] }
  0x4c   :  { %180 = vmatprep.subr.mxu0 %v91_v29  ;;  %518 = vmatpush3.msra.mxu1 %v247_v39  ;;  %v127_v9 = vld [vmem:[#allocation5 + $0x168] sm:$0xff]  ;;  %v346_v10 = vld [vmem:[#allocation8 + $0x60] sm:$0xff]  ;;  %v125_v12 = vld [vmem:[#allocation5 + $0x158] sm:$0xff] }
  0x4d   :  { %181 = vmatpush1.msra.mxu0 %v90_v31  ;;  %519 = vmatprep.subr.mxu1 %v706_v0  ;;  %v126_v11 = vld [vmem:[#allocation5 + $0x160] sm:$0xff]  ;;  %v345_v13 = vld [vmem:[#allocation8 + $0x58] sm:$0xff]  ;;  %v124_v14 = vld [vmem:[#allocation5 + $0x150] sm:$0xff] }
  0x4e   :  { %182 = vmatprep.subr.mxu0 %v89_v32  ;;  %520 = vmatpush3.msra.mxu1 %v246_v42  ;;  %v123_v15 = vld [vmem:[#allocation5 + $0x148] sm:$0xff]  ;;  %v344_v16 = vld [vmem:[#allocation8 + $0x50] sm:$0xff]  ;;  %v122_v17 = vld [vmem:[#allocation5 + $0x140] sm:$0xff] }
  0x4f   :  { %183 = vmatpush1.msra.mxu0 %v88_v34  ;;  %521 = vmatprep.subr.mxu1 %v706_v0  ;;  %v121_v18 = vld [vmem:[#allocation5 + $0x138] sm:$0xff]  ;;  %v343_v19 = vld [vmem:[#allocation8 + $0x48] sm:$0xff]  ;;  %v120_v20 = vld [vmem:[#allocation5 + $0x130] sm:$0xff] }
  0x50   :  { %184 = vmatprep.subr.mxu0 %v87_v35  ;;  %522 = vmatpush3.msra.mxu1 %v245_v45  ;;  %v119_v21 = vld [vmem:[#allocation5 + $0x128] sm:$0xff]  ;;  %v342_v22 = vld [vmem:[#allocation8 + $0x40] sm:$0xff]  ;;  %v117_v24 = vld [vmem:[#allocation5 + $0x118] sm:$0xff] }
  0x51   :  { %185 = vmatpush1.msra.mxu0 %v86_v37  ;;  %523 = vmatprep.subr.mxu1 %v706_v0  ;;  %v118_v23 = vld [vmem:[#allocation5 + $0x120] sm:$0xff]  ;;  %v341_v25 = vld [vmem:[#allocation8 + $0x38] sm:$0xff]  ;;  %v116_v26 = vld [vmem:[#allocation5 + $0x110] sm:$0xff] }
  0x52   :  { %186 = vmatprep.subr.mxu0 %v85_v38  ;;  %524 = vmatpush3.msra.mxu1 %v244_v48  ;;  %v115_v27 = vld [vmem:[#allocation5 + $0x108] sm:$0xff]  ;;  %v340_v28 = vld [vmem:[#allocation8 + $0x30] sm:$0xff]  ;;  %v114_v29 = vld [vmem:[#allocation5 + $0x100] sm:$0xff]  ;;  %v148_v38 = vlaneseq }
  0x53   :  { %187 = vmatpush1.msra.mxu0 %v84_v40  ;;  %525 = vmatprep.subr.mxu1 %v706_v0  ;;  %v339_v30 = vld [vmem:[#allocation8 + $0x28] sm:$0xff]  ;;  %v338_v31 = vld [vmem:[#allocation8 + $0x20] sm:$0xff]  ;;  %v337_v32 = vld [vmem:[#allocation8 + $0x18] sm:$0xff] }
  0x54   :  { %188 = vmatprep.subr.mxu0 %v83_v41  ;;  %526 = vmatpush3.msra.mxu1 %v243_v51  ;;  %v336_v33 = vld [vmem:[#allocation8 + $0x10] sm:$0xff]  ;;  %v335_v34 = vld [vmem:[#allocation8 + $0x8] sm:$0xff]  ;;  %v334_v35 = vld [vmem:[#allocation8] sm:$0xff]  ;;  %v149_v39 = vshrl.u32 %v148_v38, 7 }
  0x55   :  { %189 = vmatpush1.msra.mxu0 %v82_v43  ;;  %527 = vmatprep.subr.mxu1 %v706_v0  ;;  %v146_v41 = vld [vmem:[%s820_s2] sm:$0x3] }
  0x56   :  { %190 = vmatprep.subr.mxu0 %v145_v44  ;;  %528 = vmatpush3.msra.mxu1 %v242_v54  ;;  %v150_v40 = vsub.s32 0, %v149_v39  ;;  %v154_v43 = vsub.s32 1, %v149_v39 }
  0x57   :  { %191 = vmatpush2.msra.mxu0 %v144_v46  ;;  %529 = vmatprep.subr.mxu1 %v706_v0 }
  0x58   :  { %192 = vmatprep.subr.mxu0 %v143_v47  ;;  %530 = vmatpush3.msra.mxu1 %v241_v57  ;;  %v151_v42 = vrot.slane %v146_v41, %v150_v40  ;;  %v155_v47 = vrot.slane %v146_v41, %v154_v43 }
  0x59   :  { %193 = vmatpush2.msra.mxu0 %v142_v49  ;;  %534 = vmatprep.subr.mxu1 %v706_v0 }
  0x5a   :  { %194 = vmatprep.subr.mxu0 %v141_v50  ;;  %222 = vmatprep.mubr.f32.mxu0 %v779_v60 }
  0x5b   :  { %195 = vmatpush2.msra.mxu0 %v140_v52  ;;  %532 = vmatmul.mubr.f32.vlgmr.msra.gmra.mxu1 %v781_v62 }
  0x5c   :  { %196 = vmatprep.subr.mxu0 %v139_v53  ;;  %535 = vmatpush3.msra.mxu1 %v349_v1 }
  0x5d   :  { %197 = vmatpush2.msra.mxu0 %v138_v55  ;;  %536 = vmatprep.subr.mxu1 %v706_v0  ;;  %v464_v55 = vld [vmem:[%s824_s6] ss:$0 sm:$0xff]  ;;  %s670_s6 = scalar_lea.vmem %s449_s27, 128 }
  0x5e   :  { %198 = vmatprep.subr.mxu0 %v137_v56  ;;  %537 = vmatpush3.msra.mxu1 %v348_v4  ;;  %p671_p6 = scmp.ne.s32.totalorder %s449_s27, %s670_s6  ;;  %p676_p8 = scmp.lt.s32.totalorder %s670_s6, %s670_s6 }
  0x5f   :  { %199 = vmatpush2.msra.mxu0 %v136_v58  ;;  %538 = vmatprep.subr.mxu1 %v706_v0  ;;  %v463_v58 = vld [vmem:[%s822_s4] ss:$0 sm:$0xff] }
  0x60   :  { %200 = vmatprep.subr.mxu0 %v135_v59  ;;  %539 = vmatpush3.msra.mxu1 %v347_v7  ;;  %p677_p9 = por %p676_p8, %p675_p7 }
  0x61   :  { %201 = vmatpush2.msra.mxu0 %v134_v61  ;;  %540 = vmatprep.subr.mxu1 %v706_v0 }
  0x62   :  { %202 = vmatprep.subr.mxu0 %v133_v63  ;;  %541 = vmatpush3.msra.mxu1 %v346_v10  ;;  %p678_p10 = pnand %p677_p9, %p671_p6 }
  0x63   :  { %203 = vmatpush2.msra.mxu0 %v132_v2  ;;  %542 = vmatprep.subr.mxu1 %v706_v0 }
  0x64   :  { %204 = vmatprep.subr.mxu0 %v131_v3  ;;  %543 = vmatpush3.msra.mxu1 %v345_v13 }
  0x65   :  { %205 = vmatpush2.msra.mxu0 %v130_v5  ;;  %544 = vmatprep.subr.mxu1 %v706_v0 }
  0x66   :  { %206 = vmatprep.subr.mxu0 %v129_v6  ;;  %545 = vmatpush3.msra.mxu1 %v344_v16 }
  0x67   :  { %207 = vmatpush2.msra.mxu0 %v128_v8  ;;  %546 = vmatprep.subr.mxu1 %v706_v0 }
  0x68   :  { %208 = vmatprep.subr.mxu0 %v127_v9  ;;  %547 = vmatpush3.msra.mxu1 %v343_v19 }
  0x69   :  { %209 = vmatpush2.msra.mxu0 %v126_v11  ;;  %548 = vmatprep.subr.mxu1 %v706_v0 }
  0x6a   :  { %210 = vmatprep.subr.mxu0 %v125_v12  ;;  %549 = vmatpush3.msra.mxu1 %v342_v22 }
  0x6b   :  { %211 = vmatpush2.msra.mxu0 %v124_v14  ;;  %550 = vmatprep.subr.mxu1 %v706_v0 }
  0x6c   :  { %212 = vmatprep.subr.mxu0 %v123_v15  ;;  %551 = vmatpush3.msra.mxu1 %v341_v25 }
  0x6d   :  { %213 = vmatpush2.msra.mxu0 %v122_v17  ;;  %552 = vmatprep.subr.mxu1 %v706_v0 }
  0x6e   :  { %214 = vmatprep.subr.mxu0 %v121_v18  ;;  %553 = vmatpush3.msra.mxu1 %v340_v28 }
  0x6f   :  { %215 = vmatpush2.msra.mxu0 %v120_v20  ;;  %554 = vmatprep.subr.mxu1 %v706_v0 }
  0x70   :  { %216 = vmatprep.subr.mxu0 %v119_v21  ;;  %555 = vmatpush3.msra.mxu1 %v339_v30 }
  0x71   :  { %217 = vmatpush2.msra.mxu0 %v118_v23  ;;  %556 = vmatprep.subr.mxu1 %v706_v0 }
  0x72   :  { %218 = vmatprep.subr.mxu0 %v117_v24  ;;  %566 = vmatprep.mubr.msk.f32.mxu1 %vm707_vm0, %v706_v0 }
  0x73   :  { %219 = vmatpush2.msra.mxu0 %v116_v26  ;;  %557 = vmatpush3.msra.mxu1 %v338_v31 }
  0x74   :  { %220 = vmatprep.subr.mxu0 %v115_v27  ;;  %558 = vmatprep.subr.mxu1 %v706_v0 }
  0x75   :  { %221 = vmatpush2.msra.mxu0 %v114_v29  ;;  %559 = vmatpush3.msra.mxu1 %v337_v32 }
  0x76   :  { %223 = vmatmul.mubr.f32.vlgmr.msra.gmra.mxu0 %v781_v62  ;;  %560 = vmatprep.subr.mxu1 %v706_v0 }
  0x77   :  { %561 = vmatpush3.msra.mxu1 %v336_v33 }
  0x78   :  { %562 = vmatprep.subr.mxu1 %v706_v0 }
  0x79   :  { %563 = vmatpush3.msra.mxu1 %v335_v34 }
  0x7a   :  { %564 = vmatprep.subr.mxu1 %v706_v0 }
  0x7b   :  { %565 = vmatpush3.msra.mxu1 %v334_v35 }
  0x7c   :  { %567 = vmatmul.mubr.f32.vlgmr.msra.gmra.mxu1 %v779_v60 }
 0x11b   :  { %v330_v36 = vpop.f32.mrf.mxu1 }
 0x11c   :  { %v331_v61 = vadd.f32 %v463_v58, %v330_v36 }
 0x11d   :  { %v533_v37 = vpop.f32.mrf.mxu1 }
 0x136   :  { %v224_v44 = vpop.f32.mrf.mxu0 }
 0x137   :  { %v225_v45 = vadd.f32 %v224_v44, %v151_v42 }
 0x138   :  { %v226_v48 = vpop.f32.mrf.mxu0 }
 0x139   :  { %v461_v46 = vmul.f32 -1.442695, %v225_v45  ;;  %v227_v0 = vadd.f32 %v226_v48, %v155_v47 }
 0x13b   :  { %580 = vpow2.f32 %v461_v46  ;;  %v462_v49 = vmul.f32 -1.442695, %v227_v0 }
 0x13c   :  { %v423_v50 = vpop.f32.mrf.mxu1 }
 0x13d   :  { %582 = vpow2.f32 %v462_v49  ;;  %v424_v57 = vadd.f32 %v464_v55, %v423_v50 }
 0x13e   :  { %v568_v51 = vpop.f32.mrf.mxu1 }
 0x148   :  { %v581_v52 = vpop.eup %580 }
 0x149   :  { %v232_v53 = vadd.f32 1.0, %v581_v52 }
 0x14a   :  { %v583_v54 = vpop.eup %582 }
 0x14b   :  { %584 = vrcp.f32 %v232_v53  ;;  %v238_v56 = vadd.f32 1.0, %v583_v54 }
 0x14d   :  { %586 = vrcp.f32 %v238_v56 }
 0x158   :  { %v585_v59 = vpop.eup %584 }
 0x159   :  { %v427_v62 = vmul.f32 %v585_v59, %v424_v57 }
 0x15a   :  { %v587_v1 = vpop.eup %586 }
 0x15b   :  { %v428_v63 = vadd.f32 %v427_v62, %v331_v61  ;;  %v438_v2 = vsub.f32 1.0, %v587_v1  ;;  %v437_v4 = vmul.f32 %v587_v1, %v779_v60 }
 0x15d   :  { %588 = vtanh.f32 %v428_v63 }
 0x16a   :  { %v589_v3 = vpop.eup %588 }
 0x16b   :  { %v439_v5 = vmul.f32 %v589_v3, %v438_v2 }
 0x16d   :  { %v440_v6 = vadd.f32 %v439_v5, %v437_v4 }
 0x16f   :  { %441 = vst [vmem:[#allocation10] sm:$0xff] %v440_v6 }
 0x170   :  { %681 = shalt.err (!%p678_p10)
}
 0x171   :  { %451 = dma.vmem_to_hbm [thread:$0]  %s449_s27, 128, %s825_s7, [#allocation4]  }
 0x172   :  { %696 = dma.done.wait [#allocation4], 128  }
 0x173   :  { %697 = vsyncadd [#allocation4], 4294967168 }
 0x174   :  { %455 = vsyncpa [#allocation3], 1 }
 0x175   :  { %456 = vsyncpa [#allocation6], 1 }
 0x176   :  { %457 = vsyncpa [#allocation9], 1 }
 0x177   :  { %458 = vsyncpa [#allocation4], 1 }

// kernel: tpu_custom_call.1
= control target key start
LH: loop header
LB: loop body
LE: loop exit
PB: predicated region body
PF: predicated region fallthrough
CT: control target
= control target key end

     0   :  { %12 = vsyncpa [#allocation3], 0  ;;  %s818_s0 = inlined_call_operand.hbm [shape: f32[8,256], index: 0, kind: input, shape index: {}]   ;;  %s819_s1 = inlined_call_operand.hbm [shape: f32[256,256], index: 1, kind: input, shape index: {}]   ;;  %s820_s2 = inlined_call_operand.vmem [shape: f32[1,256], index: 2, kind: input, shape index: {}]   ;;  %s821_s3 = inlined_call_operand.hbm [shape: f32[128,128], index: 3, kind: input, shape index: {}]   ;;  %s822_s4 = inlined_call_operand.vmem [shape: f32[1,128], index: 4, kind: input, shape index: {}]   ;;  %s823_s5 = inlined_call_operand.hbm [shape: f32[128,128], index: 5, kind: input, shape index: {}]   ;;  %s824_s6 = inlined_call_operand.vmem [shape: f32[1,128], index: 6, kind: input, shape index: {}]   ;;  %s825_s7 = inlined_call_operand.hbm [shape: f32[8,128], index: 7, kind: output, shape index: {}]  }
   0x1   :  { %13 = vsyncpa [#allocation6], 0 }
   0x2   :  { %14 = vsyncpa [#allocation9], 0 }
   0x3   :  { %15 = vsyncpa [#allocation4], 0  ;;  %s698_s24 = smov [#allocation5]  }
   0x4   :  { %s31_s25 = sshll.u32 %s698_s24, 4  ;;  %s32_s25 = int_to_ptr.vmem [resolvable:$true] %s31_s25 }
   0x5   :  { %s598_s26 = scalar_lea.vmem %s32_s25, 8192  ;;  %p603_p1 = scmp.lt.s32.totalorder %s32_s25, %s32_s25 }
   0x6   :  { %p599_p0 = scmp.ne.s32.totalorder %s32_s25, %s598_s26  ;;  %p604_p2 = scmp.lt.s32.totalorder %s598_s26, %s598_s26 }
   0x8   :  { %p605_p3 = por %p604_p2, %p603_p1 }
   0xa   :  { %p606_p4 = pnand %p605_p3, %p599_p0 }
   0xc   :  { %609 = shalt.err (!%p606_p4)
}
   0xd   :  { %s699_s27 = smov 256   ;;  %s700_s28 = smov 16  }
   0xe   :  { %37 = dma.hbm_to_vmem [thread:$0]  %s819_s1, 8192, %s32_s25, [#allocation6], %s699_s27, %s699_s27, %s700_s28  }
   0xf   :  { %s701_s8 = smov [#allocation2]   ;;  %s702_s10 = smov [#allocation7]  }
  0x10   :  { %s22_s9 = sshll.u32 %s701_s8, 4  ;;  %s45_s11 = sshll.u32 %s702_s10, 4  ;;  %s23_s9 = int_to_ptr.vmem [resolvable:$true] %s22_s9  ;;  %s46_s11 = int_to_ptr.vmem [resolvable:$true] %s45_s11 }
  0x11   :  { %s618_s12 = scalar_lea.vmem %s23_s9, 256  ;;  %p623_p6 = scmp.lt.s32.totalorder %s23_s9, %s23_s9 }
  0x12   :  { %p619_p5 = scmp.ne.s32.totalorder %s23_s9, %s618_s12  ;;  %p624_p7 = scmp.lt.s32.totalorder %s618_s12, %s618_s12 }
  0x14   :  { %p625_p8 = por %p624_p7, %p623_p6 }
  0x16   :  { %p626_p9 = pnand %p625_p8, %p619_p5 }
  0x18   :  { %629 = shalt.err (!%p626_p9)
}
  0x19   :  { %25 = dma.hbm_to_vmem [thread:$0]  %s818_s0, 256, %s23_s9, [#allocation3]  }
  0x1a   :  { %s638_s15 = scalar_lea.vmem %s46_s11, 2048  ;;  %p643_p11 = scmp.lt.s32.totalorder %s46_s11, %s46_s11 }
  0x1b   :  { %p639_p10 = scmp.ne.s32.totalorder %s46_s11, %s638_s15  ;;  %p644_p12 = scmp.lt.s32.totalorder %s638_s15, %s638_s15 }
  0x1d   :  { %p645_p13 = por %p644_p12, %p643_p11 }
  0x1f   :  { %p646_p0 = pnand %p645_p13, %p639_p10 }
  0x21   :  { %649 = shalt.err (!%p646_p0)
}
  0x22   :  { %s703_s1 = smov 128   ;;  %s704_s16 = smov 8  }
  0x23   :  { %51 = dma.hbm_to_vmem [thread:$0]  %s821_s3, 2048, %s46_s11, [#allocation6], %s703_s1, %s703_s1, %s704_s16  }
  0x24   :  { %s705_s19 = smov [#allocation8]  }
  0x25   :  { %s59_s20 = sshll.u32 %s705_s19, 4  ;;  %s60_s20 = int_to_ptr.vmem [resolvable:$true] %s59_s20 }
  0x26   :  { %s658_s21 = scalar_lea.vmem %s60_s20, 2048  ;;  %p663_p2 = scmp.lt.s32.totalorder %s60_s20, %s60_s20 }
  0x27   :  { %p659_p1 = scmp.ne.s32.totalorder %s60_s20, %s658_s21  ;;  %p664_p3 = scmp.lt.s32.totalorder %s658_s21, %s658_s21 }
  0x29   :  { %p665_p4 = por %p664_p3, %p663_p2 }
  0x2b   :  { %p666_p5 = pnand %p665_p4, %p659_p1 }
  0x2d   :  { %669 = shalt.err (!%p666_p5)
}
  0x2e   :  { %65 = dma.hbm_to_vmem [thread:$0]  %s823_s5, 2048, %s60_s20, [#allocation9], %s703_s1, %s703_s1, %s704_s16  }
  0x2f   :  { %690 = dma.done.wait [#allocation3], 256  }
  0x30   :  { %691 = vsyncadd [#allocation3], 4294967040 }
  0x31   :  { %692 = dma.done.wait [#allocation6], 10240  }
  0x32   :  { %693 = vsyncadd [#allocation6], 4294957056 }
  0x33   :  { %694 = dma.done.wait [#allocation9], 2048  }
  0x34   :  { %695 = vsyncadd [#allocation9], 4294965248  ;;  %v706_v0 = vmov 0.0   ;;  %vm707_vm0 = vmmov 0   ;;  %v113_v1 = vld [vmem:[#allocation5 + $0xf8] sm:$0xff]  ;;  %v112_v2 = vld [vmem:[#allocation5 + $0xf0] sm:$0xff] }
  0x35   :  { %499 = vmatprep.subr.mxu1 %v706_v0  ;;  %531 = vmatprep.mubr.msk.f32.mxu1 %vm707_vm0, %v706_v0  ;;  %v111_v3 = vld [vmem:[#allocation5 + $0xe8] sm:$0xff]  ;;  %v110_v4 = vld [vmem:[#allocation5 + $0xe0] sm:$0xff]  ;;  %v109_v5 = vld [vmem:[#allocation5 + $0xd8] sm:$0xff]  ;;  %s708_s26 = smov [#allocation10]  }
  0x36   :  { %158 = vmatprep.subr.mxu0 %v113_v1  ;;  %v108_v6 = vld [vmem:[#allocation5 + $0xd0] sm:$0xff]  ;;  %v107_v7 = vld [vmem:[#allocation5 + $0xc8] sm:$0xff]  ;;  %v106_v8 = vld [vmem:[#allocation5 + $0xc0] sm:$0xff]  ;;  %s448_s27 = sshll.u32 %s708_s26, 4  ;;  %s449_s27 = int_to_ptr.vmem [resolvable:$true] %s448_s27 }
  0x37   :  { %159 = vmatpush1.msra.mxu0 %v112_v2  ;;  %v105_v9 = vld [vmem:[#allocation5 + $0xb8] sm:$0xff]  ;;  %v104_v10 = vld [vmem:[#allocation5 + $0xb0] sm:$0xff]  ;;  %v103_v11 = vld [vmem:[#allocation5 + $0xa8] sm:$0xff]  ;;  %p675_p7 = scmp.lt.s32.totalorder %s449_s27, %s449_s27 }
  0x38   :  { %160 = vmatprep.subr.mxu0 %v111_v3  ;;  %v102_v12 = vld [vmem:[#allocation5 + $0xa0] sm:$0xff]  ;;  %v101_v13 = vld [vmem:[#allocation5 + $0x98] sm:$0xff]  ;;  %v100_v15 = vld [vmem:[#allocation5 + $0x90] sm:$0xff] }
  0x39   :  { %161 = vmatpush1.msra.mxu0 %v110_v4  ;;  %v256_v14 = vld [vmem:[#allocation7 + $0x78] sm:$0xff]  ;;  %v255_v16 = vld [vmem:[#allocation7 + $0x70] sm:$0xff]  ;;  %v99_v17 = vld [vmem:[#allocation5 + $0x88] sm:$0xff] }
  0x3a   :  { %162 = vmatprep.subr.mxu0 %v109_v5  ;;  %500 = vmatpush3.msra.mxu1 %v256_v14  ;;  %v254_v18 = vld [vmem:[#allocation7 + $0x68] sm:$0xff]  ;;  %v98_v19 = vld [vmem:[#allocation5 + $0x80] sm:$0xff]  ;;  %v97_v20 = vld [vmem:[#allocation5 + $0x78] sm:$0xff] }
  0x3b   :  { %163 = vmatpush1.msra.mxu0 %v108_v6  ;;  %501 = vmatprep.subr.mxu1 %v706_v0  ;;  %v253_v21 = vld [vmem:[#allocation7 + $0x60] sm:$0xff]  ;;  %v96_v22 = vld [vmem:[#allocation5 + $0x70] sm:$0xff]  ;;  %v95_v23 = vld [vmem:[#allocation5 + $0x68] sm:$0xff] }
  0x3c   :  { %164 = vmatprep.subr.mxu0 %v107_v7  ;;  %502 = vmatpush3.msra.mxu1 %v255_v16  ;;  %v252_v24 = vld [vmem:[#allocation7 + $0x58] sm:$0xff]  ;;  %v94_v25 = vld [vmem:[#allocation5 + $0x60] sm:$0xff]  ;;  %v251_v27 = vld [vmem:[#allocation7 + $0x50] sm:$0xff] }
  0x3d   :  { %165 = vmatpush1.msra.mxu0 %v106_v8  ;;  %503 = vmatprep.subr.mxu1 %v706_v0  ;;  %v93_v26 = vld [vmem:[#allocation5 + $0x58] sm:$0xff]  ;;  %v92_v28 = vld [vmem:[#allocation5 + $0x50] sm:$0xff]  ;;  %v91_v29 = vld [vmem:[#allocation5 + $0x48] sm:$0xff] }
  0x3e   :  { %166 = vmatprep.subr.mxu0 %v105_v9  ;;  %504 = vmatpush3.msra.mxu1 %v254_v18  ;;  %v250_v30 = vld [vmem:[#allocation7 + $0x48] sm:$0xff]  ;;  %v90_v31 = vld [vmem:[#allocation5 + $0x40] sm:$0xff]  ;;  %v89_v32 = vld [vmem:[#allocation5 + $0x38] sm:$0xff] }
  0x3f   :  { %167 = vmatpush1.msra.mxu0 %v104_v10  ;;  %505 = vmatprep.subr.mxu1 %v706_v0  ;;  %v249_v33 = vld [vmem:[#allocation7 + $0x40] sm:$0xff]  ;;  %v88_v34 = vld [vmem:[#allocation5 + $0x30] sm:$0xff]  ;;  %v87_v35 = vld [vmem:[#allocation5 + $0x28] sm:$0xff] }
  0x40   :  { %168 = vmatprep.subr.mxu0 %v103_v11  ;;  %506 = vmatpush3.msra.mxu1 %v253_v21  ;;  %v248_v36 = vld [vmem:[#allocation7 + $0x38] sm:$0xff]  ;;  %v86_v37 = vld [vmem:[#allocation5 + $0x20] sm:$0xff]  ;;  %v247_v39 = vld [vmem:[#allocation7 + $0x30] sm:$0xff] }
  0x41   :  { %169 = vmatpush1.msra.mxu0 %v102_v12  ;;  %507 = vmatprep.subr.mxu1 %v706_v0  ;;  %v85_v38 = vld [vmem:[#allocation5 + $0x18] sm:$0xff]  ;;  %v84_v40 = vld [vmem:[#allocation5 + $0x10] sm:$0xff]  ;;  %v83_v41 = vld [vmem:[#allocation5 + $0x8] sm:$0xff] }
  0x42   :  { %170 = vmatprep.subr.mxu0 %v101_v13  ;;  %508 = vmatpush3.msra.mxu1 %v252_v24  ;;  %v246_v42 = vld [vmem:[#allocation7 + $0x28] sm:$0xff]  ;;  %v82_v43 = vld [vmem:[#allocation5] sm:$0xff]  ;;  %v145_v44 = vld [vmem:[#allocation5 + $0x1f8] sm:$0xff] }
  0x43   :  { %171 = vmatpush1.msra.mxu0 %v100_v15  ;;  %509 = vmatprep.subr.mxu1 %v706_v0  ;;  %v245_v45 = vld [vmem:[#allocation7 + $0x20] sm:$0xff]  ;;  %v144_v46 = vld [vmem:[#allocation5 + $0x1f0] sm:$0xff]  ;;  %v143_v47 = vld [vmem:[#allocation5 + $0x1e8] sm:$0xff] }
  0x44   :  { %172 = vmatprep.subr.mxu0 %v99_v17  ;;  %510 = vmatpush3.msra.mxu1 %v251_v27  ;;  %v244_v48 = vld [vmem:[#allocation7 + $0x18] sm:$0xff]  ;;  %v142_v49 = vld [vmem:[#allocation5 + $0x1e0] sm:$0xff]  ;;  %v243_v51 = vld [vmem:[#allocation7 + $0x10] sm:$0xff] }
  0x45   :  { %173 = vmatpush1.msra.mxu0 %v98_v19  ;;  %511 = vmatprep.subr.mxu1 %v706_v0  ;;  %v141_v50 = vld [vmem:[#allocation5 + $0x1d8] sm:$0xff]  ;;  %v140_v52 = vld [vmem:[#allocation5 + $0x1d0] sm:$0xff]  ;;  %v139_v53 = vld [vmem:[#allocation5 + $0x1c8] sm:$0xff] }
  0x46   :  { %174 = vmatprep.subr.mxu0 %v97_v20  ;;  %512 = vmatpush3.msra.mxu1 %v250_v30  ;;  %v242_v54 = vld [vmem:[#allocation7 + $0x8] sm:$0xff]  ;;  %v138_v55 = vld [vmem:[#allocation5 + $0x1c0] sm:$0xff]  ;;  %v137_v56 = vld [vmem:[#allocation5 + $0x1b8] sm:$0xff] }
  0x47   :  { %175 = vmatpush1.msra.mxu0 %v96_v22  ;;  %513 = vmatprep.subr.mxu1 %v706_v0  ;;  %v241_v57 = vld [vmem:[#allocation7] sm:$0xff]  ;;  %v136_v58 = vld [vmem:[#allocation5 + $0x1b0] sm:$0xff]  ;;  %v135_v59 = vld [vmem:[#allocation5 + $0x1a8] sm:$0xff] }
  0x48   :  { %176 = vmatprep.subr.mxu0 %v95_v23  ;;  %514 = vmatpush3.msra.mxu1 %v249_v33  ;;  %v779_v60 = vld [vmem:[#allocation2 + $0x8] sm:$0xff]  ;;  %v134_v61 = vld [vmem:[#allocation5 + $0x1a0] sm:$0xff]  ;;  %v781_v62 = vld [vmem:[#allocation2] sm:$0xff] }
  0x49   :  { %177 = vmatpush1.msra.mxu0 %v94_v25  ;;  %515 = vmatprep.subr.mxu1 %v706_v0  ;;  %v133_v63 = vld [vmem:[#allocation5 + $0x198] sm:$0xff]  ;;  %v132_v2 = vld [vmem:[#allocation5 + $0x190] sm:$0xff]  ;;  %v131_v3 = vld [vmem:[#allocation5 + $0x188] sm:$0xff] }
  0x4a   :  { %178 = vmatprep.subr.mxu0 %v93_v26  ;;  %516 = vmatpush3.msra.mxu1 %v248_v36  ;;  %v349_v1 = vld [vmem:[#allocation8 + $0x78] sm:$0xff]  ;;  %v348_v4 = vld [vmem:[#allocation8 + $0x70] sm:$0xff]  ;;  %v130_v5 = vld [vmem:[#allocation5 + $0x180] sm:$0xff] }
  0x4b   :  { %179 = vmatpush1.msra.mxu0 %v92_v28  ;;  %517 = vmatprep.subr.mxu1 %v706_v0  ;;  %v129_v6 = vld [vmem:[#allocation5 + $0x178] sm:$0xff]  ;;  %v347_v7 = vld [vmem:[#allocation8 + $0x68] sm:$0xff]  ;;  %v128_v8 = vld [vmem:[#allocation5 + $0x170] sm:$0xff] }
  0x4c   :  { %180 = vmatprep.subr.mxu0 %v91_v29  ;;  %518 = vmatpush3.msra.mxu1 %v247_v39  ;;  %v127_v9 = vld [vmem:[#allocation5 + $0x168] sm:$0xff]  ;;  %v346_v10 = vld [vmem:[#allocation8 + $0x60] sm:$0xff]  ;;  %v125_v12 = vld [vmem:[#allocation5 + $0x158] sm:$0xff] }
  0x4d   :  { %181 = vmatpush1.msra.mxu0 %v90_v31  ;;  %519 = vmatprep.subr.mxu1 %v706_v0  ;;  %v126_v11 = vld [vmem:[#allocation5 + $0x160] sm:$0xff]  ;;  %v345_v13 = vld [vmem:[#allocation8 + $0x58] sm:$0xff]  ;;  %v124_v14 = vld [vmem:[#allocation5 + $0x150] sm:$0xff] }
  0x4e   :  { %182 = vmatprep.subr.mxu0 %v89_v32  ;;  %520 = vmatpush3.msra.mxu1 %v246_v42  ;;  %v123_v15 = vld [vmem:[#allocation5 + $0x148] sm:$0xff]  ;;  %v344_v16 = vld [vmem:[#allocation8 + $0x50] sm:$0xff]  ;;  %v122_v17 = vld [vmem:[#allocation5 + $0x140] sm:$0xff] }
  0x4f   :  { %183 = vmatpush1.msra.mxu0 %v88_v34  ;;  %521 = vmatprep.subr.mxu1 %v706_v0  ;;  %v121_v18 = vld [vmem:[#allocation5 + $0x138] sm:$0xff]  ;;  %v343_v19 = vld [vmem:[#allocation8 + $0x48] sm:$0xff]  ;;  %v120_v20 = vld [vmem:[#allocation5 + $0x130] sm:$0xff] }
  0x50   :  { %184 = vmatprep.subr.mxu0 %v87_v35  ;;  %522 = vmatpush3.msra.mxu1 %v245_v45  ;;  %v119_v21 = vld [vmem:[#allocation5 + $0x128] sm:$0xff]  ;;  %v342_v22 = vld [vmem:[#allocation8 + $0x40] sm:$0xff]  ;;  %v117_v24 = vld [vmem:[#allocation5 + $0x118] sm:$0xff] }
  0x51   :  { %185 = vmatpush1.msra.mxu0 %v86_v37  ;;  %523 = vmatprep.subr.mxu1 %v706_v0  ;;  %v118_v23 = vld [vmem:[#allocation5 + $0x120] sm:$0xff]  ;;  %v341_v25 = vld [vmem:[#allocation8 + $0x38] sm:$0xff]  ;;  %v116_v26 = vld [vmem:[#allocation5 + $0x110] sm:$0xff] }
  0x52   :  { %186 = vmatprep.subr.mxu0 %v85_v38  ;;  %524 = vmatpush3.msra.mxu1 %v244_v48  ;;  %v115_v27 = vld [vmem:[#allocation5 + $0x108] sm:$0xff]  ;;  %v340_v28 = vld [vmem:[#allocation8 + $0x30] sm:$0xff]  ;;  %v114_v29 = vld [vmem:[#allocation5 + $0x100] sm:$0xff]  ;;  %v148_v38 = vlaneseq }
  0x53   :  { %187 = vmatpush1.msra.mxu0 %v84_v40  ;;  %525 = vmatprep.subr.mxu1 %v706_v0  ;;  %v339_v30 = vld [vmem:[#allocation8 + $0x28] sm:$0xff]  ;;  %v338_v31 = vld [vmem:[#allocation8 + $0x20] sm:$0xff]  ;;  %v337_v32 = vld [vmem:[#allocation8 + $0x18] sm:$0xff] }
  0x54   :  { %188 = vmatprep.subr.mxu0 %v83_v41  ;;  %526 = vmatpush3.msra.mxu1 %v243_v51  ;;  %v336_v33 = vld [vmem:[#allocation8 + $0x10] sm:$0xff]  ;;  %v335_v34 = vld [vmem:[#allocation8 + $0x8] sm:$0xff]  ;;  %v334_v35 = vld [vmem:[#allocation8] sm:$0xff]  ;;  %v149_v39 = vshrl.u32 %v148_v38, 7 }
  0x55   :  { %189 = vmatpush1.msra.mxu0 %v82_v43  ;;  %527 = vmatprep.subr.mxu1 %v706_v0  ;;  %v146_v41 = vld [vmem:[%s820_s2] sm:$0x3] }
  0x56   :  { %190 = vmatprep.subr.mxu0 %v145_v44  ;;  %528 = vmatpush3.msra.mxu1 %v242_v54  ;;  %v150_v40 = vsub.s32 0, %v149_v39  ;;  %v154_v43 = vsub.s32 1, %v149_v39 }
  0x57   :  { %191 = vmatpush2.msra.mxu0 %v144_v46  ;;  %529 = vmatprep.subr.mxu1 %v706_v0 }
  0x58   :  { %192 = vmatprep.subr.mxu0 %v143_v47  ;;  %530 = vmatpush3.msra.mxu1 %v241_v57  ;;  %v151_v42 = vrot.slane %v146_v41, %v150_v40  ;;  %v155_v47 = vrot.slane %v146_v41, %v154_v43 }
  0x59   :  { %193 = vmatpush2.msra.mxu0 %v142_v49  ;;  %534 = vmatprep.subr.mxu1 %v706_v0 }
  0x5a   :  { %194 = vmatprep.subr.mxu0 %v141_v50  ;;  %222 = vmatprep.mubr.f32.mxu0 %v779_v60 }
  0x5b   :  { %195 = vmatpush2.msra.mxu0 %v140_v52  ;;  %532 = vmatmul.mubr.f32.vlgmr.msra.gmra.mxu1 %v781_v62 }
  0x5c   :  { %196 = vmatprep.subr.mxu0 %v139_v53  ;;  %535 = vmatpush3.msra.mxu1 %v349_v1 }
  0x5d   :  { %197 = vmatpush2.msra.mxu0 %v138_v55  ;;  %536 = vmatprep.subr.mxu1 %v706_v0  ;;  %v464_v55 = vld [vmem:[%s824_s6] ss:$0 sm:$0xff]  ;;  %s670_s6 = scalar_lea.vmem %s449_s27, 128 }
  0x5e   :  { %198 = vmatprep.subr.mxu0 %v137_v56  ;;  %537 = vmatpush3.msra.mxu1 %v348_v4  ;;  %p671_p6 = scmp.ne.s32.totalorder %s449_s27, %s670_s6  ;;  %p676_p8 = scmp.lt.s32.totalorder %s670_s6, %s670_s6 }
  0x5f   :  { %199 = vmatpush2.msra.mxu0 %v136_v58  ;;  %538 = vmatprep.subr.mxu1 %v706_v0  ;;  %v463_v58 = vld [vmem:[%s822_s4] ss:$0 sm:$0xff] }
  0x60   :  { %200 = vmatprep.subr.mxu0 %v135_v59  ;;  %539 = vmatpush3.msra.mxu1 %v347_v7  ;;  %p677_p9 = por %p676_p8, %p675_p7 }
  0x61   :  { %201 = vmatpush2.msra.mxu0 %v134_v61  ;;  %540 = vmatprep.subr.mxu1 %v706_v0 }
  0x62   :  { %202 = vmatprep.subr.mxu0 %v133_v63  ;;  %541 = vmatpush3.msra.mxu1 %v346_v10  ;;  %p678_p10 = pnand %p677_p9, %p671_p6 }
  0x63   :  { %203 = vmatpush2.msra.mxu0 %v132_v2  ;;  %542 = vmatprep.subr.mxu1 %v706_v0 }
  0x64   :  { %204 = vmatprep.subr.mxu0 %v131_v3  ;;  %543 = vmatpush3.msra.mxu1 %v345_v13 }
  0x65   :  { %205 = vmatpush2.msra.mxu0 %v130_v5  ;;  %544 = vmatprep.subr.mxu1 %v706_v0 }
  0x66   :  { %206 = vmatprep.subr.mxu0 %v129_v6  ;;  %545 = vmatpush3.msra.mxu1 %v344_v16 }
  0x67   :  { %207 = vmatpush2.msra.mxu0 %v128_v8  ;;  %546 = vmatprep.subr.mxu1 %v706_v0 }
  0x68   :  { %208 = vmatprep.subr.mxu0 %v127_v9  ;;  %547 = vmatpush3.msra.mxu1 %v343_v19 }
  0x69   :  { %209 = vmatpush2.msra.mxu0 %v126_v11  ;;  %548 = vmatprep.subr.mxu1 %v706_v0 }
  0x6a   :  { %210 = vmatprep.subr.mxu0 %v125_v12  ;;  %549 = vmatpush3.msra.mxu1 %v342_v22 }
  0x6b   :  { %211 = vmatpush2.msra.mxu0 %v124_v14  ;;  %550 = vmatprep.subr.mxu1 %v706_v0 }
  0x6c   :  { %212 = vmatprep.subr.mxu0 %v123_v15  ;;  %551 = vmatpush3.msra.mxu1 %v341_v25 }
  0x6d   :  { %213 = vmatpush2.msra.mxu0 %v122_v17  ;;  %552 = vmatprep.subr.mxu1 %v706_v0 }
  0x6e   :  { %214 = vmatprep.subr.mxu0 %v121_v18  ;;  %553 = vmatpush3.msra.mxu1 %v340_v28 }
  0x6f   :  { %215 = vmatpush2.msra.mxu0 %v120_v20  ;;  %554 = vmatprep.subr.mxu1 %v706_v0 }
  0x70   :  { %216 = vmatprep.subr.mxu0 %v119_v21  ;;  %555 = vmatpush3.msra.mxu1 %v339_v30 }
  0x71   :  { %217 = vmatpush2.msra.mxu0 %v118_v23  ;;  %556 = vmatprep.subr.mxu1 %v706_v0 }
  0x72   :  { %218 = vmatprep.subr.mxu0 %v117_v24  ;;  %566 = vmatprep.mubr.msk.f32.mxu1 %vm707_vm0, %v706_v0 }
  0x73   :  { %219 = vmatpush2.msra.mxu0 %v116_v26  ;;  %557 = vmatpush3.msra.mxu1 %v338_v31 }
  0x74   :  { %220 = vmatprep.subr.mxu0 %v115_v27  ;;  %558 = vmatprep.subr.mxu1 %v706_v0 }
  0x75   :  { %221 = vmatpush2.msra.mxu0 %v114_v29  ;;  %559 = vmatpush3.msra.mxu1 %v337_v32 }
  0x76   :  { %223 = vmatmul.mubr.f32.vlgmr.msra.gmra.mxu0 %v781_v62  ;;  %560 = vmatprep.subr.mxu1 %v706_v0 }
  0x77   :  { %561 = vmatpush3.msra.mxu1 %v336_v33 }
  0x78   :  { %562 = vmatprep.subr.mxu1 %v706_v0 }
  0x79   :  { %563 = vmatpush3.msra.mxu1 %v335_v34 }
  0x7a   :  { %564 = vmatprep.subr.mxu1 %v706_v0 }
  0x7b   :  { %565 = vmatpush3.msra.mxu1 %v334_v35 }
  0x7c   :  { %567 = vmatmul.mubr.f32.vlgmr.msra.gmra.mxu1 %v779_v60 }
 0x11b   :  { %v330_v36 = vpop.f32.mrf.mxu1 }
 0x11c   :  { %v331_v61 = vadd.f32 %v463_v58, %v330_v36 }
 0x11d   :  { %v533_v37 = vpop.f32.mrf.mxu1 }
 0x136   :  { %v224_v44 = vpop.f32.mrf.mxu0 }
 0x137   :  { %v225_v45 = vadd.f32 %v224_v44, %v151_v42 }
 0x138   :  { %v226_v48 = vpop.f32.mrf.mxu0 }
 0x139   :  { %v461_v46 = vmul.f32 -1.442695, %v225_v45  ;;  %v227_v0 = vadd.f32 %v226_v48, %v155_v47 }
 0x13b   :  { %580 = vpow2.f32 %v461_v46  ;;  %v462_v49 = vmul.f32 -1.442695, %v227_v0 }
 0x13c   :  { %v423_v50 = vpop.f32.mrf.mxu1 }
 0x13d   :  { %582 = vpow2.f32 %v462_v49  ;;  %v424_v57 = vadd.f32 %v464_v55, %v423_v50 }
 0x13e   :  { %v568_v51 = vpop.f32.mrf.mxu1 }
 0x148   :  { %v581_v52 = vpop.eup %580 }
 0x149   :  { %v232_v53 = vadd.f32 1.0, %v581_v52 }
 0x14a   :  { %v583_v54 = vpop.eup %582 }
 0x14b   :  { %584 = vrcp.f32 %v232_v53  ;;  %v238_v56 = vadd.f32 1.0, %v583_v54 }
 0x14d   :  { %586 = vrcp.f32 %v238_v56 }
 0x158   :  { %v585_v59 = vpop.eup %584 }
 0x159   :  { %v427_v62 = vmul.f32 %v585_v59, %v424_v57 }
 0x15a   :  { %v587_v1 = vpop.eup %586 }
 0x15b   :  { %v428_v63 = vadd.f32 %v427_v62, %v331_v61  ;;  %v438_v2 = vsub.f32 1.0, %v587_v1  ;;  %v437_v4 = vmul.f32 %v587_v1, %v779_v60 }
 0x15d   :  { %588 = vtanh.f32 %v428_v63 }
 0x16a   :  { %v589_v3 = vpop.eup %588 }
 0x16b   :  { %v439_v5 = vmul.f32 %v589_v3, %v438_v2 }
 0x16d   :  { %v440_v6 = vadd.f32 %v439_v5, %v437_v4 }
 0x16f   :  { %441 = vst [vmem:[#allocation10] sm:$0xff] %v440_v6 }
 0x170   :  { %681 = shalt.err (!%p678_p10)
}
 0x171   :  { %451 = dma.vmem_to_hbm [thread:$0]  %s449_s27, 128, %s825_s7, [#allocation4]  }
 0x172   :  { %696 = dma.done.wait [#allocation4], 128  }
 0x173   :  { %697 = vsyncadd [#allocation4], 4294967168 }
 0x174   :  { %455 = vsyncpa [#allocation3], 1 }
 0x175   :  { %456 = vsyncpa [#allocation6], 1 }
 0x176   :  { %457 = vsyncpa [#allocation9], 1 }
 0x177   :  { %458 = vsyncpa [#allocation4], 1 }

</bundles_post_ra>
